<compile_context>
chip_gen: v5e
topology: v5e:2x2
jax: 0.10.0
libtpu: 0.0.40
codegen_flags: <defaults>
</compile_context>

<pallas_src>
import functools

import jax
import jax.numpy as jnp
from jax.experimental import pallas as pl
from jax.experimental.pallas import tpu as pltpu

CHANNEL = 64            # DIDFuse `channel`
CIN = 2 * CHANNEL       # Cov7 input channels = 128
BN_EPS = 1e-5

# Max padded spatial positions per row tile:
#   input block = 2 B (bf16) * CIN * positions -> 6 MiB at 24K positions,
#   double-buffered by the BlockSpec pipeline  -> 12 MiB,
# leaving headroom for the (9, S) f32 matmul intermediate under the 32 MiB
# scoped-VMEM limit on every generation (v7x physical VMEM is 64 MiB).
_MAX_TILE_POSITIONS = 24 * 1024


def _round_up(x, m):
    return (x + m - 1) // m * m


def _cdiv(a, b):
    return -(-a // b)


def _pick_row_tile(h, wp):
    th = _MAX_TILE_POSITIONS // wp - 2
    if th >= h:
        return h
    return max(8, (th // 8) * 8)


def cov7_kernel(x_ref, w_ref, shift_ref, o_ref, *, wp):
    """One (batch, row-tile) grid step.

    x_ref    : (1, 1, CIN, sp_pad) bf16  reflection-padded rows (+2-row halo),
                                         spatial flattened at stride Wp (lanes)
    w_ref    : (9, CIN)            bf16  conv taps (r = dh*3+dw), BN scale folded
    shift_ref: (1,)                f32   SMEM folded conv-bias + BN shift
    o_ref    : (1, 1, 1, th*wp)    f32   sigmoid(BN(conv)); junk cols w>=W kept
    """
    x = x_ref[0, 0]                                            # (CIN, sp_pad) bf16
    w = w_ref[...]                                             # (9, CIN)      bf16
    # Single lane-dense MXU matmul: spatial on lanes, the 9 taps on sublanes.
    y = jnp.dot(w, x, preferred_element_type=jnp.float32)      # (9, sp_pad)   f32

    thwp = o_ref.shape[-1]
    # Tap (dh, dw) contributes y[r, q + dh*wp + dw] to output position q.
    # Shifts are applied post-contraction (128x less data than shifting x),
    # so the XLU/VPU work here hides under the input DMA.
    acc = y[0:1, 0:thwp]
    for r in range(1, 9):
        dh, dw = divmod(r, 3)
        s = dh * wp + dw
        acc = acc + y[r:r + 1, s:s + thwp]

    z = acc + shift_ref[0]                                     # folded bias + BN
    # sigmoid via EUP exp + approx EUP reciprocal (no VPU divide sequence).
    o_ref[0, 0] = pl.reciprocal(1.0 + jnp.exp(-z), approx=True).astype(o_ref.dtype)


def cov7_forward(x_nchw, w_oihw, b_conv, gamma, beta, run_mean, run_var,
                 eps=BN_EPS, row_tile=None):
    N, C, H, W = x_nchw.shape
    assert C == CIN
    Wp = W + 2

    th = row_tile if row_tile is not None else _pick_row_tile(H, Wp)
    th = max(1, min(int(th), H))
    T = _cdiv(H, th)
    Hpad = T * th

    sp = (th + 2) * Wp                       # padded positions per input tile
    sp_pad = _round_up(sp + 2, 128)          # +2: junk-column taps read past sp
    thwp = th * Wp                           # positions per (lane-dense) output tile

    # ---- wrapper glue (fused XLA pass over the activations) ----------------
    # ReflectionPad2d(1) + bf16 cast, native NCHW kept (C on sublanes).
    xpad = jnp.pad(x_nchw, ((0, 0), (0, 0), (1, 1), (1, 1)),
                   mode="reflect").astype(jnp.bfloat16)        # (N, C, H+2, Wp)
    if Hpad > H:                                               # round rows to tile grid
        xpad = jnp.pad(xpad, ((0, 0), (0, 0), (0, Hpad - H), (0, 0)))
    # Row tiles with a 2-row halo (duplicates 2 rows per tile; no 3x im2col).
    xt = jnp.stack([xpad[:, :, t * th:t * th + th + 2, :] for t in range(T)],
                   axis=1)                                     # (N, T, C, th+2, Wp)
    xt = xt.reshape(N, T, C, sp)
    if sp_pad > sp:
        xt = jnp.pad(xt, ((0, 0), (0, 0), (0, 0), (0, sp_pad - sp)))

    # Fold conv bias + BatchNorm (eval) into the weights (scale) + scalar shift.
    inv_std = 1.0 / jnp.sqrt(run_var + eps)
    scale = (gamma * inv_std)[0]
    shift = (beta + (b_conv - run_mean) * gamma * inv_std)[0]
    wmat = (jnp.transpose(w_oihw[0], (1, 2, 0)).reshape(9, C)
            * scale).astype(jnp.bfloat16)                      # (9, C), r = dh*3+dw
    shift_arr = jnp.reshape(shift, (1,)).astype(jnp.float32)

    out = pl.pallas_call(
        functools.partial(cov7_kernel, wp=Wp),
        out_shape=jax.ShapeDtypeStruct((N, T, 1, thwp), jnp.float32),
        grid_spec=pltpu.PrefetchScalarGridSpec(
            num_scalar_prefetch=0,
            grid=(N, T),
            in_specs=[
                pl.BlockSpec((1, 1, C, sp_pad), lambda n, t: (n, t, 0, 0)),
                pl.BlockSpec((9, C), lambda n, t: (0, 0)),
                pl.BlockSpec(memory_space=pltpu.MemorySpace.SMEM),
            ],
            out_specs=pl.BlockSpec((1, 1, 1, thwp), lambda n, t: (n, t, 0, 0)),
        ),
        compiler_params=pltpu.CompilerParams(
            dimension_semantics=("parallel", "parallel"),
            vmem_limit_bytes=32 * 1024 * 1024),
    )(xt, wmat, shift_arr)

    # Drop the 2 junk columns per row and the row round-up; back to NCHW.
    out = out.reshape(N, Hpad, Wp)[:, :H, :W]
    return out.reshape(N, 1, H, W)


def reference_forward(x_nchw, w_oihw, b_conv, gamma, beta, run_mean, run_var,
                      eps=BN_EPS):
    xp = jnp.pad(x_nchw, ((0, 0), (0, 0), (1, 1), (1, 1)), mode="reflect")
    y = jax.lax.conv_general_dilated(
        xp, w_oihw, window_strides=(1, 1), padding="VALID",
        dimension_numbers=("NCHW", "OIHW", "NCHW"))
    y = y + b_conv[None, :, None, None]
    y = (y - run_mean[None, :, None, None]) / jnp.sqrt(
        run_var[None, :, None, None] + eps)
    y = y * gamma[None, :, None, None] + beta[None, :, None, None]
    return jax.nn.sigmoid(y)


if __name__ == "__main__":
    key = jax.random.PRNGKey(0)
    k_x, k_w, k_b, k_g, k_be, k_m, k_v, k_x2 = jax.random.split(key, 8)

    # Parameter shapes from Cov7.__init__ (Conv2d(128, 1, 3), BatchNorm2d(1)).
    w_oihw = 0.05 * jax.random.normal(k_w, (1, CIN, 3, 3), jnp.float32)
    b_conv = 0.01 * jax.random.normal(k_b, (1,), jnp.float32)
    gamma = 1.0 + 0.1 * jax.random.normal(k_g, (1,), jnp.float32)
    beta = 0.1 * jax.random.normal(k_be, (1,), jnp.float32)
    run_mean = 0.1 * jax.random.normal(k_m, (1,), jnp.float32)
    run_var = jnp.abs(jax.random.normal(k_v, (1,), jnp.float32)) + 0.5

    # Primary check: DIDFuse-like small input (single row tile per image).
    N, H, W = 2, 16, 16
    x = jax.random.normal(k_x, (N, CIN, H, W), jnp.float32)
    out = jax.block_until_ready(
        cov7_forward(x, w_oihw, b_conv, gamma, beta, run_mean, run_var))
    ref = reference_forward(x, w_oihw, b_conv, gamma, beta, run_mean, run_var)
    assert out.shape == (N, 1, H, W)
    err = float(jnp.max(jnp.abs(out - ref)))
    assert jnp.allclose(out, ref, atol=1e-2, rtol=1e-2), err

    # Secondary check: forces multiple row tiles (T > 1) to exercise the
    # halo'd row tiling and junk-column handling.
    H2, W2 = 24, 16
    x2 = jax.random.normal(k_x2, (1, CIN, H2, W2), jnp.float32)
    out2 = jax.block_until_ready(
        cov7_forward(x2, w_oihw, b_conv, gamma, beta, run_mean, run_var,
                     row_tile=8))
    ref2 = reference_forward(x2, w_oihw, b_conv, gamma, beta, run_mean, run_var)
    assert out2.shape == (1, 1, H2, W2)
    err2 = float(jnp.max(jnp.abs(out2 - ref2)))
    assert jnp.allclose(out2, ref2, atol=1e-2, rtol=1e-2), err2

    print("KERNEL_OK")
</pallas_src>

<mosaic_0001>
module attributes {stable_mosaic.version = 11 : i64} {
  func.func @cov7_kernel(%arg0: i32, %arg1: i32, %arg2: memref<1x1x128x384xbf16, #tpu.memory_space<vmem>>, %arg3: memref<9x128xbf16, #tpu.memory_space<vmem>>, %arg4: memref<1xf32, #tpu.memory_space<smem>>, %arg5: memref<1x1x1x288xf32, #tpu.memory_space<vmem>>) attributes {dimension_semantics = [#tpu.dimension_semantics<parallel>, #tpu.dimension_semantics<parallel>], iteration_bounds = array<i64: 2, 1>, scalar_prefetch = 0 : i64, scratch_operands = 0 : i64, tpu.core_type = #tpu.core_type<tc>, window_params = [{transform_indices = @transform_0, window_bounds = array<i64: 1, 1, 128, 384>}, {pipeline_mode = #tpu.pipeline_mode<synchronous>, transform_indices = @transform_1, window_bounds = array<i64: 9, 128>}, {transform_indices = @transform_2, window_bounds = array<i64: 1>}, {transform_indices = @transform_3, window_bounds = array<i64: 1, 1, 1, 288>}]} {
    %c0 = arith.constant 0 : index
    %c0_0 = arith.constant 0 : index
    %c0_1 = arith.constant 0 : index
    %c0_2 = arith.constant 0 : index
    %0 = vector.load %arg2[%c0, %c0_0, %c0_1, %c0_2] : memref<1x1x128x384xbf16, #tpu.memory_space<vmem>>, vector<1x1x128x384xbf16>
    %1 = vector.shape_cast %0 : vector<1x1x128x384xbf16> to vector<128x384xbf16>
    %c0_3 = arith.constant 0 : index
    %c0_4 = arith.constant 0 : index
    %2 = vector.load %arg3[%c0_3, %c0_4] : memref<9x128xbf16, #tpu.memory_space<vmem>>, vector<9x128xbf16>
    %cst = arith.constant dense<0.000000e+00> : vector<9x384xf32>
    %3 = tpu.matmul %2, %1, %cst {dimension_numbers = #tpu.dot_dimension_numbers<[1], [0], [0], [1], [0, 0, 1, 1], [], []>} : vector<9x128xbf16>, vector<128x384xbf16>, vector<9x384xf32> -> vector<9x384xf32>
    %4 = vector.extract_strided_slice %3 {offsets = [0, 0], sizes = [1, 288], strides = [1, 1]} : vector<9x384xf32> to vector<1x288xf32>
    %5 = vector.extract_strided_slice %3 {offsets = [1, 1], sizes = [1, 288], strides = [1, 1]} : vector<9x384xf32> to vector<1x288xf32>
    %6 = arith.addf %4, %5 : vector<1x288xf32>
    %7 = vector.extract_strided_slice %3 {offsets = [2, 2], sizes = [1, 288], strides = [1, 1]} : vector<9x384xf32> to vector<1x288xf32>
    %8 = arith.addf %6, %7 : vector<1x288xf32>
    %9 = vector.extract_strided_slice %3 {offsets = [3, 18], sizes = [1, 288], strides = [1, 1]} : vector<9x384xf32> to vector<1x288xf32>
    %10 = arith.addf %8, %9 : vector<1x288xf32>
    %11 = vector.extract_strided_slice %3 {offsets = [4, 19], sizes = [1, 288], strides = [1, 1]} : vector<9x384xf32> to vector<1x288xf32>
    %12 = arith.addf %10, %11 : vector<1x288xf32>
    %13 = vector.extract_strided_slice %3 {offsets = [5, 20], sizes = [1, 288], strides = [1, 1]} : vector<9x384xf32> to vector<1x288xf32>
    %14 = arith.addf %12, %13 : vector<1x288xf32>
    %15 = vector.extract_strided_slice %3 {offsets = [6, 36], sizes = [1, 288], strides = [1, 1]} : vector<9x384xf32> to vector<1x288xf32>
    %16 = arith.addf %14, %15 : vector<1x288xf32>
    %17 = vector.extract_strided_slice %3 {offsets = [7, 37], sizes = [1, 288], strides = [1, 1]} : vector<9x384xf32> to vector<1x288xf32>
    %18 = arith.addf %16, %17 : vector<1x288xf32>
    %19 = vector.extract_strided_slice %3 {offsets = [8, 38], sizes = [1, 288], strides = [1, 1]} : vector<9x384xf32> to vector<1x288xf32>
    %20 = arith.addf %18, %19 : vector<1x288xf32>
    %c0_5 = arith.constant 0 : index
    %21 = memref.load %arg4[%c0_5] : memref<1xf32, #tpu.memory_space<smem>>
    %22 = vector.broadcast %21 : f32 to vector<1x288xf32>
    %23 = arith.addf %20, %22 : vector<1x288xf32>
    %cst_6 = arith.constant 0.000000e+00 : f32
    %24 = vector.broadcast %cst_6 : f32 to vector<1x288xf32>
    %25 = arith.subf %24, %23 : vector<1x288xf32>
    %26 = math.exp %25 : vector<1x288xf32>
    %cst_7 = arith.constant 1.000000e+00 : f32
    %27 = vector.broadcast %cst_7 : f32 to vector<1x288xf32>
    %28 = arith.addf %27, %26 : vector<1x288xf32>
    %29 = tpu.reciprocal %28 {approx = true} : vector<1x288xf32> -> vector<1x288xf32>
    %c0_8 = arith.constant 0 : index
    %c0_9 = arith.constant 0 : index
    %c0_10 = arith.constant 0 : index
    %c0_11 = arith.constant 0 : index
    %30 = vector.load %arg5[%c0_8, %c0_9, %c0_10, %c0_11] : memref<1x1x1x288xf32, #tpu.memory_space<vmem>>, vector<1x1x1x288xf32>
    %31 = vector.shape_cast %30 : vector<1x1x1x288xf32> to vector<1x288xf32>
    %32 = vector.shape_cast %29 : vector<1x288xf32> to vector<1x1x1x288xf32>
    tpu.vector_store %arg5[%c0_8, %c0_9, %c0_10, %c0_11], %32 {strides = array<i32>} : memref<1x1x1x288xf32, #tpu.memory_space<vmem>>, vector<1x1x1x288xf32>,
    return
  }
  func.func @transform_0(%arg0: i32, %arg1: i32) -> (i32, i32, i32, i32) {
    %c0_i32 = arith.constant 0 : i32
    %c0_i32_0 = arith.constant 0 : i32
    %c0_i32_1 = arith.constant 0 : i32
    return %arg0, %arg1, %c0_i32, %c0_i32_0 : i32, i32, i32, i32
  }
  func.func @transform_1(%arg0: i32, %arg1: i32) -> (i32, i32) {
    %c0_i32 = arith.constant 0 : i32
    %c0_i32_0 = arith.constant 0 : i32
    %c0_i32_1 = arith.constant 0 : i32
    return %c0_i32, %c0_i32_0 : i32, i32
  }
  func.func @transform_2(%arg0: i32, %arg1: i32) -> i32 {
    %c0_i32 = arith.constant 0 : i32
    %c0_i32_0 = arith.constant 0 : i32
    return %c0_i32 : i32
  }
  func.func @transform_3(%arg0: i32, %arg1: i32) -> (i32, i32, i32, i32) {
    %c0_i32 = arith.constant 0 : i32
    %c0_i32_0 = arith.constant 0 : i32
    %c0_i32_1 = arith.constant 0 : i32
    return %arg0, %arg1, %c0_i32, %c0_i32_0 : i32, i32, i32, i32
  }
}

</mosaic_0001>

<bundles_post_ra>
// kernel: tpu_custom_call.1
= control target key start
LH: loop header
LB: loop body
LE: loop exit
PB: predicated region body
PF: predicated region fallthrough
CT: control target
= control target key end

     0   :  { %s1381_s0 = inlined_call_operand.hbm [shape: bf16[2,1,128,384], index: 0, kind: input, shape index: {}]   ;;  %s1382_s1 = inlined_call_operand.hbm [shape: bf16[9,128], index: 1, kind: input, shape index: {}]   ;;  %s1383_s2 = inlined_call_operand.<no memory space> [shape: f32[1], index: 2, kind: input, shape index: {}]   ;;  %s1384_s3 = inlined_call_operand.hbm [shape: f32[2,1,1,288], index: 3, kind: output, shape index: {}]  }
   0x1   :  { %8 = sst [smem:[#allocation2]] %s1383_s2 }
   0x2   :  { %9 = vsyncpa [#allocation4], 0 }
   0x3   :  { %11 = vsyncpa [#allocation4 + $0x1], 0 }
   0x4   :  { %12 = vsyncpa [#allocation7], 0 }
   0x5   :  { %13 = vsyncpa [#allocation5], 0 }
   0x6   :  { %15 = vsyncpa [#allocation5 + $0x1], 0  ;;  %s1151_s14 = smov 0   ;;  %s1153_s15 = smov 0  }
   0x7   :  { %s1155_s16 = smov 0   ;;  %s1157_s17 = smov 0  }
   0x8   :  { %s1159_s18 = smov 0   ;;  %s1161_s19 = smov 0  }
   0x9 LB: > { %s730_s2 = sadd.s32 4294967295, %s1113_s19   ;;  %s731_s20 = sadd.s32 4294967294, %s1113_s19   ;;  %s1113_s19 = sphi %s1161_s19, %s21_s19   ;;  %s1109_s18 = sphi %s1159_s18, %s1395_s18   ;;  %s1105_s17 = sphi %s1157_s17, %s1394_s17   ;;  %s1101_s16 = sphi %s1155_s16, %s1393_s16   ;;  %s1097_s15 = sphi %s1153_s15, %s1392_s15   ;;  %s1093_s14 = sphi %s1151_s14, %s1391_s14  }
   0xa   : > { %p55_p0 = scmp.ne.s32.totalorder %s1097_s15, %s1093_s14  ;;  %p1185_p1 = scmp.eq.s32.totalorder %s730_s2, 0 }
   0xb   : > { %p1189_p2 = scmp.eq.s32.totalorder %s730_s2, 1  ;;  %p129_p3 = scmp.eq.s32.totalorder %s731_s20, 1 }
   0xc   : > { %p1195_p4 = por %p1185_p1, %p55_p0  ;;  %p732_p5 = scmp.ge.s32.totalorder %s1113_s19, 1 }
   0xd   : > { %p1200_p6 = por %p129_p3, %p55_p0  ;;  %p136_p7 = scmp.lt.s32.totalorder %s1113_s19, 3 }
   0xe   : > { %s147_s27 = sshll.u32 %s1382_s1, 4  ;;  %s1115_s29 = smov [#allocation6]   ;;  %s148_s27 = int_to_ptr.hbm [resolvable:$true] %s147_s27 }
   0xf   : > { %p1208_p8 = pnand %p732_p5, %p136_p7  ;;  %s149_s30 = sshll.u32 %s1115_s29, 4  ;;  %s150_s30 = int_to_ptr.vmem [resolvable:$true] %s149_s30 }
  0x10   : > { %p734_p11 = scmp.ge.s32.totalorder %s1113_s19, 2  ;;  %s1116_s4 = smov 64  }
  0x11   : > { %p878_p9 = pneg %p1208_p8  ;;  %s1117_s5 = smov 4  }
  0x12   : > { %s33_s6 = sadd.s32 1, %s1109_s18  ;;  %s42_s7 = sadd.s32 1, %s1101_s16 }
  0x13   : > { %p879_p10 = pnand %p878_p9, %p1185_p1  ;;  %p35_p12 = scmp.ge.s32.totalorder %s33_s6, 2 }
  0x14   : > { %p49_p13 = scmp.ne.s32.totalorder %s1101_s16, %s1097_s15  ;;  %p50_p0 = scmp.eq.s32.totalorder %s1113_s19, 0 }
  0x15   : > { %881 = dma.hbm_to_vmem [thread:$0]  (!%p879_p10), %s148_s27, 128, %s150_s30, [#allocation7], %s1116_s4, %s1116_s4, %s1117_s5  }
  0x16   : > { %s1397_s6 = smov (%p35_p12, %s33_s6), 0  ;;  %p51_p3 = por %p50_p0, %p49_p13 }
  0x17   : > { %p1226_p5 = por %p1189_p2, %p49_p13  ;;  %s37_s9 = ssub.s32 %s1109_s18, %s1397_s6 }
  0x18   : > { %p891_p7 = scmp.lt.s32.totalorder %s1113_s19, 2  ;;  %p40_p9 = scmp.eq.s32.totalorder %s37_s9, 0 }
  0x19   : > { %s166_s10 = sand.u32 1, %s1101_s16   ;;  %s866_s13 = smul.u32 192, %s1109_s18 }
  0x1a   : > { %s865_s11 = smul.u32 192, %s166_s10  ;;  %p883_p10 = pnand %p891_p7, %p51_p3 }
  0x1b   : > { %s1235_s12 = scalar_select %p40_p9, %s1101_s16, %s42_s7  }
  0x1c   : > { %s170_s2 = scalar_lea.vmem [#allocation3], %s865_s11  ;;  %s177_s27 = scalar_lea.hbm %s1381_s0, %s866_s13 }
  0x1d   : > { %s180_s20 = sshll.u32 %s170_s2, 4  ;;  %s178_s22 = sshll.u32 %s177_s27, 4  ;;  %s181_s20 = int_to_ptr.vmem [resolvable:$true] %s180_s20  ;;  %s179_s22 = int_to_ptr.hbm [resolvable:$true] %s178_s22 }
  0x1e   : > { %s167_s29 = scalar_lea.sflag [#allocation4], %s166_s10  ;;  %s1118_s30 = smov 192  }
  0x1f   : > { %s1119_s4 = smov 12   ;;  %192 = sbr.rel (%p1208_p8) target bundleno = 407 (0x197), region = 32 }
  0x20   : > { %885 = dma.hbm_to_vmem [thread:$0]  (!%p883_p10), %s179_s22, 3072, %s181_s20, %s167_s29, %s1118_s30, %s1118_s30, %s1119_s4  }
  0x21   : > { %s1244_s5 = sand.u32 (!%p1208_p8), 1, %s1097_s15  }
  0x22   : > { %s867_s7 = smul.u32 (!%p1208_p8), 192, %s1244_s5  ;;  %s195_s9 = scalar_lea.sflag (!%p1208_p8), [#allocation4], %s1244_s5 }
  0x24   : > { %s1248_s11 = scalar_lea.vmem [#allocation3], %s867_s7 }
  0x25   : > { %1080 = dma.done.wait (%p1195_p4), %s195_s9, 3072  }
  0x26   : > { %1082 = vsyncadd (%p1195_p4), %s195_s9, 4294964224 }
  0x27   : > { %1084 = dma.done.wait (%p1185_p1), [#allocation7], 128  }
  0x28   : > { %1086 = vsyncadd (%p1185_p1), [#allocation7], 4294967168  ;;  %v828_v0 = vld [vmem:[%s1248_s11 + $0xa8] sm:$0xf]  ;;  %v862_v1 = vld [vmem:[%s1248_s11 + $0xb0] sm:$0xf0] }
  0x29   : > { %v861_v2 = vld [vmem:[%s1248_s11 + $0xac] sm:$0xf]  ;;  %v829_v3 = vor.u32 %v862_v1, %v828_v0  ;;  %v830_v4 = vld [vmem:[%s1248_s11 + $0xb4] sm:$0xf0]  ;;  %v836_v5 = vld [vmem:[%s1248_s11 + $0xb0] sm:$0xf] }
  0x2a   : > { %v863_v6 = vld [vmem:[%s1248_s11 + $0xb8] sm:$0xf0]  ;;  %v833_v7 = vor.u32 %v861_v2, %v830_v4  ;;  %v816_v9 = vld [vmem:[%s1248_s11 + $0x90] sm:$0xf]  ;;  %v858_v11 = vld [vmem:[%s1248_s11 + $0x94] sm:$0xf] }
  0x2b   : > { %v837_v8 = vor.u32 %v863_v6, %v836_v5  ;;  %v859_v10 = vld [vmem:[%s1248_s11 + $0x98] sm:$0xf0]  ;;  %395 = vmatpush.bf16.msra.mxu0 %v829_v3  ;;  %v818_v13 = vld [vmem:[%s1248_s11 + $0x9c] sm:$0xf0]  ;;  %v824_v14 = vld [vmem:[%s1248_s11 + $0x98] sm:$0xf] }
  0x2c   : > { %v817_v12 = vor.u32 %v859_v10, %v816_v9  ;;  %v860_v15 = vld [vmem:[%s1248_s11 + $0xa0] sm:$0xf0]  ;;  %409 = vmatpush.bf16.msra.mxu1 %v833_v7  ;;  %v821_v16 = vor.u32 %v858_v11, %v818_v13  ;;  %v804_v18 = vld [vmem:[%s1248_s11 + $0x78] sm:$0xf]  ;;  %v855_v20 = vld [vmem:[%s1248_s11 + $0x7c] sm:$0xf] }
  0x2d   : > { %423 = vmatpush.bf16.msra.mxu2 %v837_v8  ;;  %v825_v17 = vor.u32 %v860_v15, %v824_v14  ;;  %v856_v19 = vld [vmem:[%s1248_s11 + $0x80] sm:$0xf0]  ;;  %v806_v21 = vld [vmem:[%s1248_s11 + $0x84] sm:$0xf0]  ;;  %v812_v22 = vld [vmem:[%s1248_s11 + $0x80] sm:$0xf] }
  0x2e   : > { %v857_v23 = vld [vmem:[%s1248_s11 + $0x88] sm:$0xf0]  ;;  %v805_v24 = vor.u32 %v856_v19, %v804_v18  ;;  %v809_v25 = vor.u32 %v855_v20, %v806_v21  ;;  %v792_v27 = vld [vmem:[%s1248_s11 + $0x60] sm:$0xf]  ;;  %v852_v29 = vld [vmem:[%s1248_s11 + $0x64] sm:$0xf] }
  0x2f   : > { %396 = vmatpush.bf16.msra.mxu0 %v817_v12  ;;  %v813_v26 = vor.u32 %v857_v23, %v812_v22  ;;  %v853_v28 = vld [vmem:[%s1248_s11 + $0x68] sm:$0xf0]  ;;  %v794_v30 = vld [vmem:[%s1248_s11 + $0x6c] sm:$0xf0]  ;;  %v800_v31 = vld [vmem:[%s1248_s11 + $0x68] sm:$0xf] }
  0x30   : > { %410 = vmatpush.bf16.msra.mxu1 %v821_v16  ;;  %v854_v32 = vld [vmem:[%s1248_s11 + $0x70] sm:$0xf0]  ;;  %v793_v33 = vor.u32 %v853_v28, %v792_v27  ;;  %v797_v34 = vor.u32 %v852_v29, %v794_v30  ;;  %v780_v36 = vld [vmem:[%s1248_s11 + $0x48] sm:$0xf]  ;;  %v849_v38 = vld [vmem:[%s1248_s11 + $0x4c] sm:$0xf] }
  0x31   : > { %424 = vmatpush.bf16.msra.mxu2 %v825_v17  ;;  %v801_v35 = vor.u32 %v854_v32, %v800_v31  ;;  %v850_v37 = vld [vmem:[%s1248_s11 + $0x50] sm:$0xf0]  ;;  %v782_v39 = vld [vmem:[%s1248_s11 + $0x54] sm:$0xf0]  ;;  %v788_v40 = vld [vmem:[%s1248_s11 + $0x50] sm:$0xf] }
  0x32   : > { %v851_v41 = vld [vmem:[%s1248_s11 + $0x58] sm:$0xf0]  ;;  %v781_v42 = vor.u32 %v850_v37, %v780_v36  ;;  %v785_v43 = vor.u32 %v849_v38, %v782_v39  ;;  %v768_v45 = vld [vmem:[%s1248_s11 + $0x30] sm:$0xf]  ;;  %v846_v47 = vld [vmem:[%s1248_s11 + $0x34] sm:$0xf] }
  0x33   : > { %397 = vmatpush.bf16.msra.mxu0 %v805_v24  ;;  %v789_v44 = vor.u32 %v851_v41, %v788_v40  ;;  %v847_v46 = vld [vmem:[%s1248_s11 + $0x38] sm:$0xf0]  ;;  %v770_v48 = vld [vmem:[%s1248_s11 + $0x3c] sm:$0xf0]  ;;  %v776_v49 = vld [vmem:[%s1248_s11 + $0x38] sm:$0xf] }
  0x34   : > { %411 = vmatpush.bf16.msra.mxu1 %v809_v25  ;;  %v848_v50 = vld [vmem:[%s1248_s11 + $0x40] sm:$0xf0]  ;;  %v769_v51 = vor.u32 %v847_v46, %v768_v45  ;;  %v773_v52 = vor.u32 %v846_v47, %v770_v48  ;;  %v756_v54 = vld [vmem:[%s1248_s11 + $0x18] sm:$0xf]  ;;  %v843_v56 = vld [vmem:[%s1248_s11 + $0x1c] sm:$0xf] }
  0x35   : > { %425 = vmatpush.bf16.msra.mxu2 %v813_v26  ;;  %v777_v53 = vor.u32 %v848_v50, %v776_v49  ;;  %v844_v55 = vld [vmem:[%s1248_s11 + $0x20] sm:$0xf0]  ;;  %v758_v57 = vld [vmem:[%s1248_s11 + $0x24] sm:$0xf0]  ;;  %v764_v58 = vld [vmem:[%s1248_s11 + $0x20] sm:$0xf] }
  0x36   : > { %v845_v59 = vld [vmem:[%s1248_s11 + $0x28] sm:$0xf0]  ;;  %v757_v60 = vor.u32 %v844_v55, %v756_v54  ;;  %v761_v61 = vor.u32 %v843_v56, %v758_v57  ;;  %v744_v63 = vld [vmem:[%s1248_s11] sm:$0xf]  ;;  %v840_v1 = vld [vmem:[%s1248_s11 + $0x4] sm:$0xf] }
  0x37   : > { %398 = vmatpush.bf16.msra.mxu0 %v793_v33  ;;  %v765_v62 = vor.u32 %v845_v59, %v764_v58  ;;  %v841_v0 = vld [vmem:[%s1248_s11 + $0x8] sm:$0xf0]  ;;  %v746_v2 = vld [vmem:[%s1248_s11 + $0xc] sm:$0xf0]  ;;  %v752_v3 = vld [vmem:[%s1248_s11 + $0x8] sm:$0xf] }
  0x38   : > { %412 = vmatpush.bf16.msra.mxu1 %v797_v34  ;;  %v842_v4 = vld [vmem:[%s1248_s11 + $0x10] sm:$0xf0]  ;;  %v745_v5 = vor.u32 %v841_v0, %v744_v63  ;;  %v740_v6 = vld [vmem:[#allocation6] sm:$0xf]  ;;  %v864_v7 = vld [vmem:[#allocation6] sm:$0x10]  ;;  %v749_v8 = vor.u32 %v840_v1, %v746_v2 }
  0x39   : > { %426 = vmatpush.bf16.msra.mxu2 %v801_v35  ;;  %v753_v9 = vor.u32 %v842_v4, %v752_v3  ;;  %v741_v10 = vor.u32 %v864_v7, %v740_v6  ;;  %s1120_s21 = smov 126   ;;  %s1121_s23 = smov 127   ;;  %vm449_vm0 = vcmask 1039360   ;;  %vm467_vm1 = vcmask 1031168  }
  0x3a   : > { %s1122_s28 = smov 110   ;;  %s1123_s10 = smov 109   ;;  %vm485_vm2 = vcmask 900096   ;;  %vm503_vm3 = vcmask 891904   ;;  %vm521_vm4 = vcmask 883712   ;;  %vm539_vm5 = vcmask 752640  }
  0x3b   : > { %399 = vmatpush.bf16.msra.mxu0 %v781_v42  ;;  %s1124_s13 = smov 108   ;;  %s1125_s2 = smov 92   ;;  %vm557_vm6 = vcmask 744448   ;;  %vm575_vm7 = vcmask 736256   ;;  %vm609_vm8 = vcmask 1040384   ;;  %vm611_vm9 = vcmask 1041408  }
  0x3c   : > { %413 = vmatpush.bf16.msra.mxu1 %v785_v43  ;;  %s1126_s20 = smov 91   ;;  %s1127_s25 = smov 90  }
  0x3d   : > { %427 = vmatpush.bf16.msra.mxu2 %v789_v44  ;;  %s584_s26 = sld [smem:[#allocation2]]  ;;  %s868_s27 = smul.u32 3, %s1244_s5 }
  0x3e   : > { %s869_s22 = smul.u32 3, %s1105_s17  ;;  %s620_s17 = scalar_lea.sflag [#allocation5], %s1244_s5 }
  0x3f   : > { %400 = vmatpush.bf16.msra.mxu0 %v769_v51  ;;  %s226_s7 = scalar_lea.vmem [#allocation8], %s868_s27 }
  0x40   : > { %414 = vmatpush.bf16.msra.mxu1 %v773_v52  ;;  %s632_s4 = scalar_lea.hbm %s1384_s3, %s869_s22  ;;  %s634_s9 = sshll.u32 %s226_s7, 4  ;;  %s635_s9 = int_to_ptr.vmem [resolvable:$true] %s634_s9 }
  0x41   : > { %428 = vmatpush.bf16.msra.mxu2 %v777_v53  ;;  %s636_s11 = sshll.u32 %s632_s4, 4  ;;  %s637_s11 = int_to_ptr.hbm [resolvable:$true] %s636_s11 }
  0x43   : > { %401 = vmatpush.bf16.msra.mxu0 %v757_v60 }
  0x44   : > { %415 = vmatpush.bf16.msra.mxu1 %v761_v61 }
  0x45   : > { %429 = vmatpush.bf16.msra.mxu2 %v765_v62 }
  0x47   : > { %402 = vmatpush.bf16.msra.mxu0 %v745_v5 }
  0x48   : > { %416 = vmatpush.bf16.msra.mxu1 %v749_v8 }
  0x49   : > { %430 = vmatpush.bf16.msra.mxu2 %v753_v9 }
  0x4a   : > { %403 = vmatmul.bf16.vlgmr.msra.gmra.mxu0 %v741_v10 }
  0x4b   : > { %417 = vmatmul.bf16.vlgmr.msra.gmra.mxu1 %v741_v10 }
  0x4c   : > { %431 = vmatmul.bf16.vlgmr.msra.gmra.mxu2 %v741_v10 }
  0xc7   : > { %v1306_v11 = vpop.f32.mrf.mxu0 }
  0xc8   : > { %v1308_v12 = vpop.f32.mrf.mxu1  ;;  %v458_v13 = vrot.slane %v1306_v11, 2  ;;  %v440_v14 = vrot.slane %v1306_v11, 1  ;;  %v476_v16 = vrot.slane %v1306_v11, 3  ;;  %v494_v21 = vrot.slane %v1306_v11, 4 }
  0xc9   : > { %v441_v15 = vrot.slane %v1308_v12, 1  ;;  %v459_v17 = vrot.slane %v1308_v12, 2  ;;  %v477_v18 = vrot.slane %v1308_v12, 3  ;;  %v495_v22 = vrot.slane %v1308_v12, 4 }
  0xca   : > { %461 = vrot.lane.b32.xlu2 %v458_v13, %s1120_s21  ;;  %443 = vrot.lane.b32.xlu1 %v440_v14, %s1121_s23  ;;  %v512_v23 = vrot.slane %v1306_v11, 5  ;;  %v513_v25 = vrot.slane %v1308_v12, 5  ;;  %v530_v26 = vrot.slane %v1306_v11, 6  ;;  %v531_v28 = vrot.slane %v1308_v12, 6 }
  0xcb   : > { %445 = vrot.lane.b32.xlu0 %v441_v15, %s1121_s23  ;;  %v548_v32 = vrot.slane %v1306_v11, 7  ;;  %v549_v34 = vrot.slane %v1308_v12, 7 }
  0xcf   : > { %v1320_v19 = vpop.f32.mrf.mxu2  ;;  %v406_v35 = vpop.f32.mrf.mxu0 }
  0xd0   : > { %v478_v20 = vrot.slane %v1320_v19, 3  ;;  %v496_v24 = vrot.slane %v1320_v19, 4  ;;  %v514_v27 = vrot.slane %v1320_v19, 5  ;;  %v460_v29 = vrot.slane %v1320_v19, 2  ;;  %v420_v37 = vpop.f32.mrf.mxu1 }
  0xd1   : > { %v532_v30 = vrot.slane %v1320_v19, 6  ;;  %v442_v31 = vrot.slane %v1320_v19, 1  ;;  %v550_v33 = vrot.slane %v1320_v19, 7 }
  0xd2   : > { %479 = vrot.lane.b32.xlu2 %v476_v16, %s1122_s28  ;;  %463 = vrot.lane.b32.xlu1 %v459_v17, %s1120_s21 }
  0xd3   : > { %481 = vrot.lane.b32.xlu0 %v477_v18, %s1122_s28 }
  0xd7   : > { %v434_v36 = vpop.f32.mrf.mxu2 }
  0xda   : > { %497 = vrot.lane.b32.xlu2 %v494_v21, %s1123_s10  ;;  %483 = vrot.lane.b32.xlu1 %v478_v20, %s1122_s28 }
  0xdb   : > { %499 = vrot.lane.b32.xlu0 %v495_v22, %s1123_s10 }
  0xe2   : > { %515 = vrot.lane.b32.xlu2 %v512_v23, %s1124_s13  ;;  %501 = vrot.lane.b32.xlu1 %v496_v24, %s1123_s10 }
  0xe3   : > { %517 = vrot.lane.b32.xlu0 %v513_v25, %s1124_s13 }
  0xea   : > { %533 = vrot.lane.b32.xlu2 %v530_v26, %s1125_s2  ;;  %519 = vrot.lane.b32.xlu1 %v514_v27, %s1124_s13  ;;  %s1047_s13 = scalar_lea.hbm %s1384_s3, 6 }
  0xeb   : > { %535 = vrot.lane.b32.xlu0 %v531_v28, %s1125_s2  ;;  %v585_v28 = vstv %s584_s26 }
  0xf2   : > { %465 = vrot.lane.b32.xlu2 %v460_v29, %s1120_s21  ;;  %537 = vrot.lane.b32.xlu1 %v532_v30, %s1125_s2  ;;  %s1041_s21 = sshra.s32 %s637_s11, 4  ;;  %s1042_s21 = int_to_ptr.hbm [resolvable:$true] %s1041_s21 }
  0xf3   : > { %447 = vrot.lane.b32.xlu0 %v442_v31, %s1121_s23  ;;  %s1043_s23 = scalar_lea.hbm %s1042_s21, 3  ;;  %p1048_p8 = scmp.lt.s32.totalorder %s1042_s21, %s1384_s3 }
  0xf4   : > { %p1044_p1 = scmp.ne.s32.totalorder %s1042_s21, %s1043_s23  ;;  %p1049_p12 = scmp.lt.s32.totalorder %s1047_s13, %s1043_s23 }
  0xf6   : > { %p1045_p2 = pnand %p1044_p1, %p1226_p5  ;;  %p1050_p13 = por %p1049_p12, %p1048_p8 }
  0xf8   : > { %p1046_p4 = pneg %p1045_p2 }
  0xfa   : > { %551 = vrot.lane.b32.xlu2 %v548_v32, %s1126_s20  ;;  %555 = vrot.lane.b32.xlu1 %v550_v33, %s1126_s20  ;;  %p1051_p0 = pnand %p1050_p13, %p1046_p4 }
  0xfb   : > { %553 = vrot.lane.b32.xlu0 %v549_v34, %s1126_s20 }
 0x102   : > { %569 = vrot.lane.b32.xlu2 %v406_v35, %s1127_s25  ;;  %573 = vrot.lane.b32.xlu1 %v434_v36, %s1127_s25 }
 0x103   : > { %571 = vrot.lane.b32.xlu0 %v420_v37, %s1127_s25 }
 0x124   : > { %v462_v38 = vpop.permute.xlu2 %461 }
 0x12c   : > { %v480_v39 = vpop.permute.xlu2 %479 }
 0x134   : > { %v498_v42 = vpop.permute.xlu2 %497 }
 0x13c   : > { %v444_v40 = vpop.permute.xlu1 %443  ;;  %v516_v46 = vpop.permute.xlu2 %515 }
 0x13d   : > { %v446_v41 = vpop.permute.xlu0 %445 }
 0x13e   : > { %v450_v54 = vsel %vm449_vm0, %v444_v40, %v446_v41 }
 0x13f   : > { %v455_v60 = vadd.f32 %v450_v54, %v1306_v11  ;;  %v614_v54 = vlaneseq }
 0x141   : > { %vm616_vm10 = vcmp.lt.s32.totalorder %v614_v54, 288 }
 0x144   : > { %v464_v43 = vpop.permute.xlu1 %463  ;;  %v534_v50 = vpop.permute.xlu2 %533 }
 0x145   : > { %v482_v44 = vpop.permute.xlu0 %481  ;;  %v468_v57 = vsel %vm467_vm1, %v462_v38, %v464_v43 }
 0x146   : > { %v473_v0 = vadd.f32 %v468_v57, %v455_v60  ;;  %v486_v6 = vsel %vm485_vm2, %v480_v39, %v482_v44 }
 0x148   : > { %v491_v11 = vadd.f32 %v486_v6, %v473_v0 }
 0x14c   : > { %v484_v45 = vpop.permute.xlu1 %483  ;;  %v466_v53 = vpop.permute.xlu2 %465 }
 0x14d   : > { %v500_v47 = vpop.permute.xlu0 %499  ;;  %v469_v62 = vsel %vm467_vm1, %v464_v43, %v466_v53  ;;  %v487_v2 = vsel %vm485_vm2, %v482_v44, %v484_v45 }
 0x14e   : > { %v504_v7 = vsel %vm503_vm3, %v498_v42, %v500_v47 }
 0x14f   : > { %v509_v17 = vadd.f32 %v504_v7, %v491_v11 }
 0x154   : > { %v502_v48 = vpop.permute.xlu1 %501  ;;  %v552_v4 = vpop.permute.xlu2 %551 }
 0x155   : > { %v518_v49 = vpop.permute.xlu0 %517  ;;  %v505_v8 = vsel %vm503_vm3, %v500_v47, %v502_v48 }
 0x156   : > { %v522_v14 = vsel %vm521_vm4, %v516_v46, %v518_v49 }
 0x157   : > { %v527_v22 = vadd.f32 %v522_v14, %v509_v17 }
 0x15c   : > { %v520_v51 = vpop.permute.xlu1 %519  ;;  %v570_v30 = vpop.permute.xlu2 %569 }
 0x15d   : > { %v536_v52 = vpop.permute.xlu0 %535  ;;  %v523_v15 = vsel %vm521_vm4, %v518_v49, %v520_v51 }
 0x164   : > { %v538_v55 = vpop.permute.xlu1 %537 }
 0x165   : > { %v448_v56 = vpop.permute.xlu0 %447  ;;  %v541_v20 = vsel %vm539_vm5, %v536_v52, %v538_v55 }
 0x166   : > { %v451_v58 = vsel %vm449_vm0, %v446_v41, %v448_v56  ;;  %v457_v59 = vadd.f32 %v448_v56, %v1320_v19  ;;  %v540_v19 = vsel %vm539_vm5, %v534_v50, %v536_v52 }
 0x167   : > { %v456_v61 = vadd.f32 %v451_v58, %v1308_v12  ;;  %v545_v25 = vadd.f32 %v540_v19, %v527_v22 }
 0x168   : > { %v475_v63 = vadd.f32 %v466_v53, %v457_v59 }
 0x169   : > { %v474_v1 = vadd.f32 %v469_v62, %v456_v61 }
 0x16a   : > { %v493_v3 = vadd.f32 %v484_v45, %v475_v63 }
 0x16b   : > { %v492_v5 = vadd.f32 %v487_v2, %v474_v1 }
 0x16c   : > { %v556_v9 = vpop.permute.xlu1 %555  ;;  %v511_v10 = vadd.f32 %v502_v48, %v493_v3 }
 0x16d   : > { %v510_v12 = vadd.f32 %v505_v8, %v492_v5  ;;  %v554_v13 = vpop.permute.xlu0 %553 }
 0x16e   : > { %v529_v16 = vadd.f32 %v520_v51, %v511_v10  ;;  %v558_v24 = vsel %vm557_vm6, %v552_v4, %v554_v13  ;;  %v559_v27 = vsel %vm557_vm6, %v554_v13, %v556_v9 }
 0x16f   : > { %v528_v18 = vadd.f32 %v523_v15, %v510_v12  ;;  %v563_v31 = vadd.f32 %v558_v24, %v545_v25 }
 0x170   : > { %v547_v21 = vadd.f32 %v538_v55, %v529_v16 }
 0x171   : > { %v546_v23 = vadd.f32 %v541_v20, %v528_v18 }
 0x172   : > { %v565_v26 = vadd.f32 %v556_v9, %v547_v21 }
 0x173   : > { %v564_v32 = vadd.f32 %v559_v27, %v546_v23 }
 0x174   : > { %v574_v29 = vpop.permute.xlu1 %573 }
 0x175   : > { %v583_v33 = vadd.f32 %v574_v29, %v565_v26  ;;  %v572_v34 = vpop.permute.xlu0 %571 }
 0x176   : > { %v576_v35 = vsel %vm575_vm7, %v570_v30, %v572_v34  ;;  %v577_v36 = vsel %vm575_vm7, %v572_v34, %v574_v29 }
 0x177   : > { %v588_v37 = vadd.f32 %v585_v28, %v583_v33  ;;  %v581_v38 = vadd.f32 %v576_v35, %v563_v31  ;;  %v582_v39 = vadd.f32 %v577_v36, %v564_v32 }
 0x179   : > { %v591_v40 = vsub.f32 0.0, %v588_v37  ;;  %v586_v41 = vadd.f32 %v585_v28, %v581_v38  ;;  %v587_v42 = vadd.f32 %v585_v28, %v582_v39 }
 0x17b   : > { %v596_v43 = vmul.f32 1.442695, %v591_v40  ;;  %v589_v44 = vsub.f32 0.0, %v586_v41  ;;  %v590_v45 = vsub.f32 0.0, %v587_v42 }
 0x17d   : > { %955 = vpow2.f32 %v596_v43  ;;  %v592_v46 = vmul.f32 1.442695, %v589_v44  ;;  %v594_v47 = vmul.f32 1.442695, %v590_v45 }
 0x17f   : > { %957 = vpow2.f32 %v592_v46 }
 0x180   : > { %959 = vpow2.f32 %v594_v47 }
 0x183   : > { %v956_v48 = vpop.eup %955 }
 0x184   : > { %v600_v49 = vadd.f32 1.0, %v956_v48 }
 0x185   : > { %v958_v50 = vpop.eup %957 }
 0x186   : > { %v960_v51 = vpop.eup %959  ;;  %v598_v52 = vadd.f32 1.0, %v958_v50  ;;  %961 = vrcp.f32 %v600_v49 }
 0x187   : > { %v599_v53 = vadd.f32 1.0, %v960_v51 }
 0x189   : > { %963 = vrcp.f32 %v599_v53 }
 0x18a   : > { %965 = vrcp.f32 %v598_v52 }
 0x18c   : > { %v962_v55 = vpop.eup %961 }
 0x18d   : > { %v608_v59 = vrot.slane %v962_v55, 6 }
 0x18f   : > { %v964_v56 = vpop.eup %963 }
 0x190   : > { %v607_v57 = vrot.slane %v964_v56, 7  ;;  %v966_v58 = vpop.eup %965 }
 0x192   : > { %v610_v60 = vsel %vm609_vm8, %v966_v58, %v607_v57 }
 0x193   : > { %v612_v61 = vsel %vm611_vm9, %v610_v60, %v608_v59 }
 0x194   : > { %618 = vst.msk [vmem:[%s226_s7] sm:$0x7] %vm616_vm10, %v612_v61 }
 0x195   : > { %1054 = shalt.err (!%p1051_p0)
}
 0x196   : > { %876 = dma.vmem_to_hbm [thread:$0]  (%p1226_p5), %s635_s9, 48, %s637_s11, %s620_s17  }
 0x197 PF: > { %s648_s5 = sand.u32 1, %s1093_s14   ;;  %p887_p3 = pnand %p734_p11, %p1200_p6 }
 0x198   : > { %s649_s25 = scalar_lea.sflag [#allocation5], %s648_s5 }
 0x199   : > { %p888_p7 = pneg %p887_p3 }
 0x19b   : > { %1088 = dma.done.wait (%p888_p7), %s649_s25, 48  }
 0x19c   : > { %1090 = vsyncadd (%p888_p7), %s649_s25, 4294967248  ;;  %s21_s19 = sadd.s32 1, %s1113_s19   ;;  %s1391_s14 = smov %s1097_s15 }
 0x19d   : > { %p18_p9 = scmp.ge.s32.totalorder %s21_s19, 4   ;;  %s1392_s15 = smov %s1101_s16 }
 0x19e   : > { %s1393_s16 = smov %s1235_s12  ;;  %s1394_s17 = smov %s1109_s18 }
 0x19f   : > { %s1395_s18 = smov %s1397_s6  ;;  %20 = sbr.rel (!%p18_p9) target bundleno = 9 (0x9), region = 81 }
 0x1a4   :  { %655 = vsyncpa [#allocation4], 1 }
 0x1a5   :  { %657 = vsyncpa [#allocation4 + $0x1], 1 }
 0x1a6   :  { %658 = vsyncpa [#allocation7], 1 }
 0x1a7   :  { %659 = vsyncpa [#allocation5], 1 }
 0x1a8   :  { %661 = vsyncpa [#allocation5 + $0x1], 1 }

</bundles_post_ra>
